<compile_context>
chip_gen: v7x
topology: tpu7x:2x2x1
jax: 0.10.0
libtpu: 0.0.40
codegen_flags: <defaults>
</compile_context>

<pallas_src>
import jax
import jax.numpy as jnp
from jax.experimental import pallas as pl
from jax.experimental.pallas import tpu as pltpu


_LANE = 128                            # vreg lane width
_MAX_TILE_BYTES = 4 * 1024 * 1024      # per x tile; x+out double-buffered ~16 MiB
_MAX_T_L = 8192                        # lane-tile cap (columns)
_MAX_T_R = 1024                        # row-tile cap (sublanes)
_VMEM_LIMIT_BYTES = 32 * 1024 * 1024   # fits v7x (64 MiB phys), unlocks v5e (16 MiB default)
_FAST_PATH_BYTES = 256 * 1024          # below this, plain fused XLA FMA is faster


def _cdiv(a, b):
    return -(-a // b)


def _sublane_unit(dtype):
    # Dense sublane tile: 8 for 4-byte, 16 for 2-byte, 32 for 1-byte dtypes.
    return max(8, 32 // jnp.dtype(dtype).itemsize)


def _choose_tiles(R, HW, dtype):
    itemsize = jnp.dtype(dtype).itemsize
    sub = _sublane_unit(dtype)

    # Lane tile: multiple of 128, never larger than the axis, capped.
    if HW < _LANE:
        t_l = HW                                   # full dim (always legal)
    else:
        t_l = max(_LANE, min(_MAX_T_L, (HW // _LANE) * _LANE))

    # Row tile: multiple of the dtype's sublane unit, capped by the per-tile
    # VMEM byte budget.
    if R < sub:
        t_r = R                                    # full dim (always legal)
    else:
        by_bytes = max(sub, (_MAX_TILE_BYTES // (t_l * itemsize)) // sub * sub)
        t_r = max(sub, min(_MAX_T_R, (R // sub) * sub, by_bytes))

    # Guarantee >= 2 blocks along one "parallel" axis when possible so both
    # v7x TensorCores get work (costs one extra ~0.35us step on 1-TC chips).
    if _cdiv(R, t_r) == 1 and _cdiv(HW, t_l) == 1:
        if HW > _LANE:
            t_l = min((HW // _LANE) * _LANE,
                      _cdiv(_cdiv(HW, 2), _LANE) * _LANE)
        elif R > sub:
            t_r = min((R // sub) * sub,
                      _cdiv(_cdiv(R, 2), sub) * sub)
    return t_r, t_l


def _normalize_kernel(scale_ref, bias_ref, x_ref, o_ref):
    # scale/bias: (T_R, 128) lane-replicated slabs; take column 0 and let the
    # (T_R, 1) value broadcast across the lane axis (lands in VPU/XLU slack of
    # this memory-bound kernel).
    s = scale_ref[...][:, :1]
    b = bias_ref[...][:, :1]
    o_ref[...] = (x_ref[...] * s + b).astype(o_ref.dtype)


def normalization_forward(img, mean, std, *, force_pallas=False):
    """(img - mean.view(C,1,1)) / std.view(C,1,1) for img of shape (N, C, H, W)."""
    N, C, H, W = img.shape
    R, HW = N * C, H * W

    # Integer images would silently truncate on the final cast -> use float32.
    out_dtype = img.dtype if jnp.issubdtype(img.dtype, jnp.floating) else jnp.float32
    x = img.astype(out_dtype)

    # Fold the divide into a multiply-add (computed once, outside the kernel).
    scale_c = 1.0 / std.astype(jnp.float32)             # (C,)
    bias_c = (-mean.astype(jnp.float32)) * scale_c      # (C,)

    total_bytes = R * HW * jnp.dtype(out_dtype).itemsize
    if not force_pallas and total_bytes < _FAST_PATH_BYTES:
        # Tiny inputs: launch + pipeline prologue dominate a sub-us memory op.
        out = x * scale_c.reshape(C, 1, 1) + bias_c.reshape(C, 1, 1)
        return out.astype(out_dtype)

    x2 = x.reshape(R, HW)

    # Per-row coefficients (row = n*C + c), replicated across 128 lanes only.
    # Constant along the inner grid axis -> DMA'd once per row-block; tiny
    # HBM/VMEM footprint compared to full-tile-width slabs.
    scale2d = jnp.broadcast_to(jnp.tile(scale_c, N)[:, None], (R, _LANE))
    bias2d = jnp.broadcast_to(jnp.tile(bias_c, N)[:, None], (R, _LANE))

    T_R, T_L = _choose_tiles(R, HW, out_dtype)
    grid = (_cdiv(R, T_R), _cdiv(HW, T_L))

    out = pl.pallas_call(
        _normalize_kernel,
        out_shape=jax.ShapeDtypeStruct((R, HW), out_dtype),
        grid=grid,
        in_specs=[
            # coefficient slabs: same block for every column tile of a row tile
            pl.BlockSpec((T_R, _LANE), lambda r, c: (r, 0)),
            pl.BlockSpec((T_R, _LANE), lambda r, c: (r, 0)),
            # image: dense (T_R, T_L) tile per grid step (ragged last blocks
            # handled by the cdiv grid + masking).
            pl.BlockSpec((T_R, T_L), lambda r, c: (r, c)),
        ],
        out_specs=pl.BlockSpec((T_R, T_L), lambda r, c: (r, c)),
        compiler_params=pltpu.CompilerParams(
            dimension_semantics=("parallel", "parallel"),
            vmem_limit_bytes=_VMEM_LIMIT_BYTES,
        ),
    )(scale2d, bias2d, x2)

    return out.reshape(N, C, H, W)


if __name__ == "__main__":
    key = jax.random.PRNGKey(0)
    k1, k2, k3 = jax.random.split(key, 3)

    # --- Case 1: tiny spec-sized input (2,4,16,16) ------------------------
    N, C, H, W = 2, 4, 16, 16
    img = jax.random.normal(k1, (N, C, H, W), dtype=jnp.float32)
    mean = jnp.array([0.485, 0.456, 0.406, 0.5], dtype=jnp.float32)
    std = jnp.array([0.229, 0.224, 0.225, 0.25], dtype=jnp.float32)
    ref = (img - mean.reshape(C, 1, 1)) / std.reshape(C, 1, 1)

    # default dispatch (fast path for this tiny size)
    out_fast = jax.block_until_ready(normalization_forward(img, mean, std))
    assert jnp.allclose(out_fast, ref, atol=1e-5, rtol=1e-5), "fast-path mismatch"

    # same input forced through the Pallas kernel
    out_pallas = jax.block_until_ready(
        normalization_forward(img, mean, std, force_pallas=True))
    assert jnp.allclose(out_pallas, ref, atol=1e-5, rtol=1e-5), "pallas mismatch"

    # --- Case 2: ragged shape (H*W and N*C not (8,128)-aligned) -----------
    N2, C2, H2, W2 = 2, 3, 15, 15
    img2 = jax.random.normal(k2, (N2, C2, H2, W2), dtype=jnp.float32)
    mean2 = jnp.array([0.485, 0.456, 0.406], dtype=jnp.float32)
    std2 = jnp.array([0.229, 0.224, 0.225], dtype=jnp.float32)
    ref2 = (img2 - mean2.reshape(C2, 1, 1)) / std2.reshape(C2, 1, 1)
    out2 = jax.block_until_ready(
        normalization_forward(img2, mean2, std2, force_pallas=True))
    assert jnp.allclose(out2, ref2, atol=1e-5, rtol=1e-5), "ragged pallas mismatch"

    # --- Case 3: medium shape that takes the Pallas path by default -------
    N3, C3, H3, W3 = 2, 4, 128, 192
    img3 = jax.random.normal(k3, (N3, C3, H3, W3), dtype=jnp.float32)
    ref3 = (img3 - mean.reshape(C3, 1, 1)) / std.reshape(C3, 1, 1)
    out3 = jax.block_until_ready(normalization_forward(img3, mean, std))
    assert jnp.allclose(out3, ref3, atol=1e-5, rtol=1e-5), "medium pallas mismatch"

    print("KERNEL_OK")
</pallas_src>

<mosaic_0001>
module attributes {stable_mosaic.version = 11 : i64} {
  func.func @_normalize_kernel(%arg0: i32, %arg1: i32, %arg2: memref<8x128xf32, #tpu.memory_space<vmem>>, %arg3: memref<8x128xf32, #tpu.memory_space<vmem>>, %arg4: memref<8x128xf32, #tpu.memory_space<vmem>>, %arg5: memref<8x128xf32, #tpu.memory_space<vmem>>) attributes {dimension_semantics = [#tpu.dimension_semantics<parallel>, #tpu.dimension_semantics<parallel>], iteration_bounds = array<i64: 1, 2>, scalar_prefetch = 0 : i64, scratch_operands = 0 : i64, tpu.core_type = #tpu.core_type<tc>, window_params = [{transform_indices = @transform_0, window_bounds = array<i64: 8, 128>}, {transform_indices = @transform_1, window_bounds = array<i64: 8, 128>}, {transform_indices = @transform_2, window_bounds = array<i64: 8, 128>}, {transform_indices = @transform_3, window_bounds = array<i64: 8, 128>}]} {
    %c0 = arith.constant 0 : index
    %c0_0 = arith.constant 0 : index
    %0 = vector.load %arg2[%c0, %c0_0] : memref<8x128xf32, #tpu.memory_space<vmem>>, vector<8x128xf32>
    %1 = vector.extract_strided_slice %0 {offsets = [0, 0], sizes = [8, 1], strides = [1, 1]} : vector<8x128xf32> to vector<8x1xf32>
    %c0_1 = arith.constant 0 : index
    %c0_2 = arith.constant 0 : index
    %2 = vector.load %arg3[%c0_1, %c0_2] : memref<8x128xf32, #tpu.memory_space<vmem>>, vector<8x128xf32>
    %3 = vector.extract_strided_slice %2 {offsets = [0, 0], sizes = [8, 1], strides = [1, 1]} : vector<8x128xf32> to vector<8x1xf32>
    %c0_3 = arith.constant 0 : index
    %c0_4 = arith.constant 0 : index
    %4 = vector.load %arg4[%c0_3, %c0_4] : memref<8x128xf32, #tpu.memory_space<vmem>>, vector<8x128xf32>
    %5 = vector.broadcast %1 : vector<8x1xf32> to vector<8x128xf32>
    %6 = arith.mulf %4, %5 : vector<8x128xf32>
    %7 = vector.broadcast %3 : vector<8x1xf32> to vector<8x128xf32>
    %8 = arith.addf %6, %7 : vector<8x128xf32>
    %c0_5 = arith.constant 0 : index
    %c0_6 = arith.constant 0 : index
    %9 = vector.load %arg5[%c0_5, %c0_6] : memref<8x128xf32, #tpu.memory_space<vmem>>, vector<8x128xf32>
    tpu.vector_store %arg5[%c0_5, %c0_6], %8 {strides = array<i32>} : memref<8x128xf32, #tpu.memory_space<vmem>>, vector<8x128xf32>,
    return
  }
  func.func @transform_0(%arg0: i32, %arg1: i32) -> (i32, i32) {
    %c0_i32 = arith.constant 0 : i32
    %c0_i32_0 = arith.constant 0 : i32
    return %arg0, %c0_i32 : i32, i32
  }
  func.func @transform_1(%arg0: i32, %arg1: i32) -> (i32, i32) {
    %c0_i32 = arith.constant 0 : i32
    %c0_i32_0 = arith.constant 0 : i32
    return %arg0, %c0_i32 : i32, i32
  }
  func.func @transform_2(%arg0: i32, %arg1: i32) -> (i32, i32) {
    %c0_i32 = arith.constant 0 : i32
    return %arg0, %arg1 : i32, i32
  }
  func.func @transform_3(%arg0: i32, %arg1: i32) -> (i32, i32) {
    %c0_i32 = arith.constant 0 : i32
    return %arg0, %arg1 : i32, i32
  }
}

</mosaic_0001>

<bundles_post_ra>
// kernel: tpu_custom_call.1
= control target key start
LH: loop header
LB: loop body
LE: loop exit
PB: predicated region body
PF: predicated region fallthrough
CT: control target
= control target key end

     0   :  { %8 = vsyncpa [#allocation3], 0  ;;  %s921_s0 = inlined_call_operand.hbm [shape: f32[8,128], index: 0, kind: input, shape index: {}]   ;;  %s922_s1 = inlined_call_operand.hbm [shape: f32[8,128], index: 1, kind: input, shape index: {}]   ;;  %s923_s2 = inlined_call_operand.hbm [shape: f32[8,256], index: 2, kind: input, shape index: {}]   ;;  %s924_s3 = inlined_call_operand.hbm [shape: f32[8,256], index: 3, kind: output, shape index: {}]  }
   0x1   :  { %9 = vsyncpa [#allocation6], 0 }
   0x2   :  { %10 = vsyncpa [#allocation4], 0 }
   0x3   :  { %12 = vsyncpa [#allocation4 + $0x1], 0  ;;  %s683_s12 = smov 0   ;;  %s685_s13 = smov 0  }
   0x4   :  { %s687_s14 = smov 0   ;;  %s689_s15 = smov 0  }
   0x5   :  { %s691_s16 = smov 0   ;;  %s693_s17 = smov 0  }
   0x6 LB: > { %s714_s18 = sadd.s32 4294967295, %s656_s17   ;;  %s379_s19 = sadd.s32 4294967294, %s656_s17   ;;  %s656_s17 = sphi %s693_s17, %s18_s17   ;;  %s652_s16 = sphi %s691_s16, %s947_s16   ;;  %s648_s15 = sphi %s689_s15, %s946_s15   ;;  %s644_s14 = sphi %s687_s14, %s945_s14   ;;  %s640_s13 = sphi %s685_s13, %s944_s13   ;;  %s636_s12 = sphi %s683_s12, %s943_s12  }
   0x7   : > { %p104_p0 = scmp.ne.s32.totalorder %s640_s13, %s636_s12  ;;  %p925_p1 = scmp.eq.s32.totalorder %s714_s18, 0 }
   0x8   : > { %p136_p3 = scmp.eq.s32.totalorder %s379_s19, 1  ;;  %p380_p5 = scmp.ge.s32.totalorder %s656_s17, 1 }
   0x9   : > { %p723_p4 = por %p925_p1, %p104_p0  ;;  %p143_p7 = scmp.lt.s32.totalorder %s656_s17, 3 }
   0xa   : > { %p728_p6 = por %p136_p3, %p104_p0  ;;  %s658_s23 = smov [#allocation2]  }
   0xb   : > { %s928_s20 = scalar_select %p723_p4, 1, 0 }
   0xc   : > { %s929_s21 = scalar_select %p728_p6, 1, 0 }
   0xd   : > { %p733_p8 = pnand %p380_p5, %p143_p7  ;;  %s158_s24 = sshll.u32 %s658_s23, 4  ;;  %s159_s24 = int_to_ptr.vmem [resolvable:$true] %s158_s24 }
   0xe   : > { %s659_s25 = smov [#allocation5]   ;;  %s480_s30 = scalar_lea.hbm %s921_s0, 128 }
   0xf   : > { %s930_s22 = scalar_select %p733_p8, 1, 0 }
  0x10   : > { %p407_p10 = pneg %p733_p8  ;;  %s171_s26 = sshll.u32 %s659_s25, 4  ;;  %s746_s26 = int_to_ptr.vmem [resolvable:$true] %s171_s26 }
  0x11   : > { %p481_p12 = scmp.ne.s32.totalorder %s921_s0, %s480_s30  ;;  %p487_p5 = scmp.lt.u32.totalorder %s480_s30, %s921_s0 }
  0x12   : > { %p742_p11 = pnand %p407_p10, %p925_p1 }
  0x14   : > { %p482_p13 = pneg %p742_p11 }
  0x16   : > { %p483_p0 = pnand %p482_p13, %p481_p12 }
  0x18   : > { %p484_p3 = pneg %p483_p0 }
  0x1a   : > { %p489_p7 = pnand %p487_p5, %p484_p3 }
  0x1c   : > { %492 = shalt.err (!%p489_p7)
}
  0x1d   : > { %s493_s8 = scalar_lea.vmem %s159_s24, 128  ;;  %p501_p2 = scmp.lt.s32.totalorder %s159_s24, %s159_s24 }
  0x1e   : > { %p494_p10 = scmp.ne.s32.totalorder %s159_s24, %s493_s8  ;;  %p502_p6 = scmp.lt.s32.totalorder %s493_s8, %s493_s8 }
  0x20   : > { %p496_p9 = pnand %p494_p10, %p482_p13  ;;  %p503_p4 = por %p502_p6, %p501_p2 }
  0x22   : > { %p497_p1 = pneg %p496_p9 }
  0x24   : > { %p504_p8 = pnand %p503_p4, %p497_p1 }
  0x26   : > { %507 = shalt.err (!%p504_p8)
}
  0x27   : > { %410 = dma.hbm_to_vmem [thread:$0]  (!%p742_p11), %s921_s0, 128, %s159_s24, [#allocation3]  }
  0x28   : > { %s508_s23 = scalar_lea.hbm %s922_s1, 128 }
  0x29   : > { %p509_p9 = scmp.ne.s32.totalorder %s922_s1, %s508_s23  ;;  %p515_p4 = scmp.lt.u32.totalorder %s508_s23, %s922_s1 }
  0x2b   : > { %p511_p2 = pnand %p509_p9, %p482_p13 }
  0x2d   : > { %p512_p1 = pneg %p511_p2 }
  0x2f   : > { %p517_p6 = pnand %p515_p4, %p512_p1 }
  0x31   : > { %520 = shalt.err (!%p517_p6)
}
  0x32   : > { %s521_s24 = scalar_lea.vmem %s746_s26, 128  ;;  %p529_p3 = scmp.lt.s32.totalorder %s746_s26, %s746_s26 }
  0x33   : > { %p522_p8 = scmp.ne.s32.totalorder %s746_s26, %s521_s24  ;;  %p530_p5 = scmp.lt.s32.totalorder %s521_s24, %s521_s24 }
  0x35   : > { %p524_p12 = pnand %p522_p8, %p482_p13  ;;  %p531_p7 = por %p530_p5, %p529_p3 }
  0x37   : > { %p525_p0 = pneg %p524_p12 }
  0x39   : > { %p532_p10 = pnand %p531_p7, %p525_p0 }
  0x3b   : > { %535 = shalt.err (!%p532_p10)
}
  0x3c   : > { %413 = dma.hbm_to_vmem [thread:$0]  (!%p742_p11), %s922_s1, 128, %s746_s26, [#allocation6]  }
  0x3d   : > { %s27_s6 = sadd.s32 1, %s652_s16  ;;  %s91_s7 = sadd.s32 1, %s644_s14 }
  0x3e   : > { %p28_p13 = scmp.ge.s32.totalorder %s27_s6, 2  ;;  %p98_p9 = scmp.ne.s32.totalorder %s644_s14, %s640_s13 }
  0x3f   : > { %p99_p2 = scmp.eq.s32.totalorder %s656_s17, 0  ;;  %p424_p1 = scmp.lt.s32.totalorder %s656_s17, 2 }
  0x40   : > { %s949_s6 = smov (%p28_p13, %s27_s6), 0  ;;  %p932_p6 = scmp.eq.s32.totalorder %s714_s18, 1 }
  0x41   : > { %p100_p4 = por %p99_p2, %p98_p9  ;;  %s87_s8 = ssub.s32 %s652_s16, %s949_s6 }
  0x42   : > { %p805_p8 = por %p932_p6, %p98_p9  ;;  %s182_s9 = sand.u32 1, %s656_s17  }
  0x43   : > { %p89_p12 = scmp.eq.s32.totalorder %s87_s8, 0  ;;  %s184_s10 = sand.u32 1, %s644_s14  }
  0x44   : > { %s385_s26 = sshll.u32 %s652_s16, 7  ;;  %s384_s19 = sshll.u32 %s184_s10, 3 }
  0x45   : > { %s815_s11 = scalar_select %p89_p12, %s644_s14, %s91_s7  }
  0x46   : > { %s820_s28 = scalar_lea.hbm %s923_s2, %s385_s26  ;;  %p822_p11 = pnand %p424_p1, %p100_p4 }
  0x47   : > { %s186_s30 = scalar_lea.vmem [#allocation7], %s384_s19  ;;  %s183_s4 = scalar_lea.sflag [#allocation3], %s182_s9 }
  0x48   : > { %s195_s24 = sshll.u32 %s186_s30, 4  ;;  %s536_s5 = scalar_lea.hbm %s820_s28, 128  ;;  %s826_s24 = int_to_ptr.vmem [resolvable:$true] %s195_s24 }
  0x49   : > { %p537_p0 = scmp.ne.s32.totalorder %s820_s28, %s536_s5  ;;  %p538_p3 = pneg %p822_p11 }
  0x4a   : > { %s541_s10 = scalar_lea.hbm %s923_s2, 256  ;;  %p542_p10 = scmp.lt.u32.totalorder %s820_s28, %s923_s2 }
  0x4b   : > { %p539_p5 = pnand %p538_p3, %p537_p0  ;;  %p543_p13 = scmp.lt.u32.totalorder %s541_s10, %s536_s5 }
  0x4c   : > { %p545_p2 = scmp.lt.u32.totalorder %s536_s5, %s820_s28 }
  0x4d   : > { %p540_p7 = pneg %p539_p5  ;;  %p544_p9 = por %p543_p13, %p542_p10 }
  0x4f   : > { %p546_p1 = por %p545_p2, %p544_p9 }
  0x51   : > { %p547_p4 = pnand %p546_p1, %p540_p7 }
  0x53   : > { %550 = shalt.err (!%p547_p4)
}
  0x54   : > { %s551_s9 = scalar_lea.vmem %s826_s24, 128  ;;  %s660_s19 = smov [#allocation7]  }
  0x55   : > { %p552_p6 = scmp.ne.s32.totalorder %s826_s24, %s551_s9  ;;  %s556_s25 = sshll.u32 %s660_s19, 4  ;;  %s557_s25 = int_to_ptr.vmem [resolvable:$false] %s556_s25 }
  0x56   : > { %s558_s30 = scalar_lea.vmem %s557_s25, 256  ;;  %p559_p5 = scmp.lt.s32.totalorder %s826_s24, %s557_s25 }
  0x57   : > { %p554_p12 = pnand %p552_p6, %p538_p3  ;;  %p560_p10 = scmp.lt.s32.totalorder %s558_s30, %s551_s9 }
  0x59   : > { %p555_p0 = pneg %p554_p12  ;;  %p561_p13 = por %p560_p10, %p559_p5 }
  0x5b   : > { %p562_p9 = pnand %p561_p13, %p555_p0 }
  0x5d   : > { %565 = shalt.err (!%p562_p9)
}
  0x5e   : > { %417 = dma.hbm_to_vmem [thread:$0]  (!%p822_p11), %s820_s28, 128, %s826_s24, %s183_s4  }
  0x5f   : > { %p935_p7 = scmp.ne.s32.totalorder %s930_s22, 0 }
  0x60   : > { %p936_p3 = scmp.eq.s32.totalorder (!%p935_p7), %s714_s18, 0 }
  0x61   : > { %204 = sbr.rel (%p935_p7) target bundleno = 264 (0x108), region = 32 }
  0x68   : > { %619 = dma.done.wait (%p936_p3), [#allocation3], 128   ;;  %p937_p2 = pmov %p936_p3 }
  0x6a   : > { %621 = vsyncadd (%p937_p2), [#allocation3], 4294967168  ;;  %p938_p1 = pmov %p937_p2 }
  0x6c   : > { %623 = dma.done.wait (%p938_p1), [#allocation6], 128   ;;  %p939_p4 = pmov %p938_p1 }
  0x6d   : > { %s214_s29 = sand.u32 1, %s714_s18   ;;  %s216_s28 = sand.u32 1, %s640_s13  }
  0x6e   : > { %625 = vsyncadd (%p939_p4), [#allocation6], 4294967168  ;;  %s389_s24 = sshll.u32 %s216_s28, 3  ;;  %s215_s22 = scalar_lea.sflag [#allocation3], %s214_s29 }
  0x6f   : > { %s218_s4 = scalar_lea.vmem [#allocation7], %s389_s24  ;;  %p940_p11 = scmp.ne.s32.totalorder %s928_s20, 0 }
  0x71   : > { %627 = dma.done.wait (%p940_p11), %s215_s22, 128  }
  0x72   : > { %629 = vsyncadd (%p940_p11), %s215_s22, 4294967168  ;;  %v661_v0 = vmov 0   ;;  %v241_v1 = vld [vmem:[#allocation2] sm:$0xff]  ;;  %v242_v2 = vld [vmem:[#allocation5] sm:$0xff]  ;;  %s392_s18 = sshll.u32 %s648_s15, 7  ;;  %s240_s5 = scalar_lea.vmem [#allocation8], %s389_s24 }
  0x73   : > { %479 = vset.pattern.permute.xlu0 %v661_v0  ;;  %v243_v3 = vld [vmem:[%s218_s4] sm:$0xff]  ;;  %s273_s7 = sshll.u32 %s240_s5, 4  ;;  %s873_s20 = scalar_lea.hbm %s924_s3, %s392_s18  ;;  %s875_s7 = int_to_ptr.vmem [resolvable:$true] %s273_s7 }
  0x74   : > { %246 = vperm.xlu0 %479, %v241_v1   ;;  %s258_s26 = scalar_lea.sflag [#allocation4], %s216_s28  ;;  %s566_s23 = scalar_lea.vmem %s875_s7, 128 }
  0x75   : > { %p567_p6 = scmp.ne.s32.totalorder %s875_s7, %s566_s23  ;;  %s662_s15 = smov [#allocation8]  }
  0x76   : > { %s570_s9 = sshll.u32 %s662_s15, 4  ;;  %s571_s9 = int_to_ptr.vmem [resolvable:$false] %s570_s9 }
  0x77   : > { %p568_p12 = pnand %p567_p6, %p805_p8  ;;  %s572_s19 = scalar_lea.vmem %s571_s9, 256 }
  0x78   : > { %252 = vperm.xlu0 %479, %v242_v2   ;;  %p573_p5 = scmp.lt.s32.totalorder %s875_s7, %s571_s9  ;;  %p574_p10 = scmp.lt.s32.totalorder %s572_s19, %s566_s23 }
  0x79   : > { %p569_p0 = pneg %p568_p12 }
  0x7a   : > { %p575_p13 = por %p574_p10, %p573_p5 }
  0x7c   : > { %p576_p9 = pnand %p575_p13, %p569_p0 }
  0xf3   : > { %v247_v4 = vpop.permute.xlu0 %246 }
  0xf4   : > { %v249_v5 = vmul.f32 %v247_v4, %v243_v3 }
  0xf7   : > { %v253_v6 = vpop.permute.xlu0 %252 }
  0xf8   : > { %v255_v7 = vadd.f32 %v253_v6, %v249_v5 }
  0xfa   : > { %256 = vst [vmem:[%s240_s5] sm:$0xff] %v255_v7 }
  0xfb   : > { %579 = shalt.err (!%p576_p9)
}
  0xfc   : > { %s580_s25 = scalar_lea.hbm %s873_s20, 128  ;;  %s584_s28 = scalar_lea.hbm %s924_s3, 256 }
  0xfd   : > { %p581_p7 = scmp.ne.s32.totalorder %s873_s20, %s580_s25  ;;  %p585_p1 = scmp.lt.u32.totalorder %s873_s20, %s924_s3 }
  0xfe   : > { %p586_p4 = scmp.lt.u32.totalorder %s584_s28, %s580_s25  ;;  %p588_p6 = scmp.lt.u32.totalorder %s580_s25, %s873_s20 }
  0xff   : > { %p582_p3 = pnand %p581_p7, %p805_p8 }
 0x100   : > { %p587_p11 = por %p586_p4, %p585_p1 }
 0x101   : > { %p583_p2 = pneg %p582_p3 }
 0x102   : > { %p589_p12 = por %p588_p6, %p587_p11 }
 0x104   : > { %p590_p0 = pnand %p589_p12, %p583_p2 }
 0x106   : > { %593 = shalt.err (!%p590_p0)
}
 0x107   : > { %405 = dma.vmem_to_hbm [thread:$0]  (%p805_p8), %s875_s7, 128, %s873_s20, %s258_s26  }
 0x108 PF: > { %s285_s4 = sand.u32 1, %s636_s12   ;;  %p941_p5 = scmp.ne.s32.totalorder %s929_s21, 0 }
 0x109   : > { %p942_p10 = scmp.ge.s32.totalorder %s656_s17, 2  ;;  %s286_s18 = scalar_lea.sflag [#allocation4], %s285_s4 }
 0x10b   : > { %p419_p13 = pnand %p942_p10, %p941_p5 }
 0x10d   : > { %631 = dma.done.wait (!%p419_p13), %s286_s18, 128  }
 0x10e   : > { %633 = vsyncadd (!%p419_p13), %s286_s18, 4294967168  ;;  %s18_s17 = sadd.s32 1, %s656_s17   ;;  %s943_s12 = smov %s640_s13 }
 0x10f   : > { %p15_p9 = scmp.ge.s32.totalorder %s18_s17, 4   ;;  %s944_s13 = smov %s644_s14 }
 0x110   : > { %s945_s14 = smov %s815_s11  ;;  %s946_s15 = smov %s652_s16 }
 0x111   : > { %s947_s16 = smov %s949_s6  ;;  %17 = sbr.rel (!%p15_p9) target bundleno = 6 (0x6), region = 86 }
 0x118   :  { %291 = vsyncpa [#allocation3], 1 }
 0x119   :  { %293 = vsyncpa [#allocation3 + $0x1], 1 }
 0x11a   :  { %294 = vsyncpa [#allocation6], 1 }
 0x11b   :  { %295 = vsyncpa [#allocation4], 1 }
 0x11c   :  { %297 = vsyncpa [#allocation4 + $0x1], 1 }

</bundles_post_ra>
